<compile_context>
chip_gen: v7x
topology: tpu7x:2x2x1
jax: 0.10.0
libtpu: 0.0.40
codegen_flags: <defaults>
</compile_context>

<pallas_src>
import jax
import jax.numpy as jnp
from jax.experimental import pallas as pl
from jax.experimental.pallas import tpu as pltpu

IN_FEATURES = 28 * 28      # 784
H1, H2 = 128, 64
OUT_FEATURES = 10
OUT_PAD = 128              # lane-dense output width (unmasked vst); sliced to 10 in wrapper


def _round_up(n, m):
    return ((n + m - 1) // m) * m


def studentnet_kernel(x_ref, w1_ref, b1_ref, w2_ref, b2_ref, w3_ref, b3_ref, o_ref):
    # fc1 + ReLU: x comes in as f32 (single HBM pass); cast to bf16 here for the MXU,
    # accumulate in f32, bias + ReLU on the f32 accumulator.
    x = x_ref[...].astype(jnp.bfloat16)
    h1 = jnp.dot(x, w1_ref[...], preferred_element_type=jnp.float32)
    h1 = jnp.maximum(h1 + b1_ref[...], 0.0)
    # fc2 + ReLU
    h2 = jnp.dot(h1.astype(jnp.bfloat16), w2_ref[...], preferred_element_type=jnp.float32)
    h2 = jnp.maximum(h2 + b2_ref[...], 0.0)
    # fc3 + ReLU (the PyTorch reference applies ReLU to the output as well)
    h3 = jnp.dot(h2.astype(jnp.bfloat16), w3_ref[...], preferred_element_type=jnp.float32)
    o_ref[...] = jnp.maximum(h3 + b3_ref[...], 0.0).astype(o_ref.dtype)


def prepare_params(params):
    """One-time param prep (bf16 cast, lane-pad fc3 to 128 cols). Hoisted out of forward."""
    w1, b1, w2, b2, w3, b3 = params
    w1_b = w1.astype(jnp.bfloat16)                                   # (784, 128)
    w2_b = w2.astype(jnp.bfloat16)                                   # (128, 64)
    w3_p = jnp.zeros((H2, OUT_PAD), jnp.bfloat16).at[:, :OUT_FEATURES].set(
        w3.astype(jnp.bfloat16))                                     # (64, 128)
    b1_f = b1.astype(jnp.float32).reshape(1, H1)
    b2_f = b2.astype(jnp.float32).reshape(1, H2)
    b3_p = jnp.zeros((1, OUT_PAD), jnp.float32).at[0, :OUT_FEATURES].set(
        b3.astype(jnp.float32).reshape(-1))
    return w1_b, b1_f, w2_b, b2_f, w3_p, b3_p


def studentnet_forward(x, prepped, *, tb=1024):
    """x: (B, 1, 28, 28) or (B, 784) float32; prepped = prepare_params(raw_params).
    Returns (B, 10) float32."""
    w1_b, b1_f, w2_b, b2_f, w3_p, b3_p = prepped
    B = x.shape[0]
    x_flat = x.reshape(B, -1).astype(jnp.float32)        # torch.flatten(x, 1)
    assert x_flat.shape[1] == IN_FEATURES

    # Batch tiling: no host-side batch padding (Pallas masks the partial last block).
    # tb stays a multiple of 8; cap so the grid has >= 2 steps for v7x's dual TCs.
    if B <= 8:
        tb = B                                           # block == full batch dim (legal)
    else:
        tb = min(tb, _round_up(pl.cdiv(B, 2), 8))
    grid = (pl.cdiv(B, tb),)

    const = lambda i: (0, 0)    # weights/biases fetched once, VMEM-resident across batch grid
    flops = 2 * B * (IN_FEATURES * H1 + H1 * H2 + H2 * OUT_PAD)
    bytes_accessed = (B * (IN_FEATURES * 4 + OUT_PAD * 2)
                      + (IN_FEATURES * H1 + H1 * H2 + H2 * OUT_PAD) * 2
                      + (H1 + H2 + OUT_PAD) * 4)

    out = pl.pallas_call(
        studentnet_kernel,
        out_shape=jax.ShapeDtypeStruct((B, OUT_PAD), jnp.bfloat16),
        grid=grid,
        in_specs=[
            pl.BlockSpec((tb, IN_FEATURES), lambda i: (i, 0)),   # x tile (f32), pipelined
            pl.BlockSpec((IN_FEATURES, H1), const),
            pl.BlockSpec((1, H1), const),
            pl.BlockSpec((H1, H2), const),
            pl.BlockSpec((1, H2), const),
            pl.BlockSpec((H2, OUT_PAD), const),
            pl.BlockSpec((1, OUT_PAD), const),
        ],
        out_specs=pl.BlockSpec((tb, OUT_PAD), lambda i: (i, 0)),
        compiler_params=pltpu.CompilerParams(
            dimension_semantics=("parallel",)),
        cost_estimate=pl.CostEstimate(
            flops=flops, transcendentals=0, bytes_accessed=bytes_accessed),
    )(x_flat, w1_b, b1_f, w2_b, b2_f, w3_p, b3_p)
    return out[:, :OUT_FEATURES].astype(jnp.float32)


def init_params(key):
    """Deterministic init mimicking torch.nn.Linear default U(-1/sqrt(in), 1/sqrt(in))."""
    dims = [(IN_FEATURES, H1), (H1, H2), (H2, OUT_FEATURES)]
    params = []
    for fan_in, fan_out in dims:
        kw, kb, key = jax.random.split(key, 3)
        bound = 1.0 / (fan_in ** 0.5)
        w = jax.random.uniform(kw, (fan_in, fan_out), jnp.float32, -bound, bound)
        b = jax.random.uniform(kb, (1, fan_out), jnp.float32, -bound, bound)
        params += [w, b]
    return tuple(params)


if __name__ == "__main__":
    key = jax.random.PRNGKey(0)
    kx, kp = jax.random.split(key)
    params = init_params(kp)
    prepped = prepare_params(params)   # one-time weight/bias prep (cast + lane pad)

    def ref_fwd(x):
        xf = x.reshape(x.shape[0], -1)
        w1, b1, w2, b2, w3, b3 = params
        h = jnp.maximum(xf @ w1 + b1, 0.0)
        h = jnp.maximum(h @ w2 + b2, 0.0)
        return jnp.maximum(h @ w3 + b3, 0.0)

    # Small MNIST-shaped batch, consistent with the 28*28 fc1 input.
    B = 2
    x = jax.random.normal(kx, (B, 1, 28, 28), dtype=jnp.float32)
    out = jax.block_until_ready(studentnet_forward(x, prepped))
    assert out.shape == (B, 10)
    # bf16 matmul operands + bf16 output -> loosen tolerance vs. pure-f32 reference
    assert jnp.allclose(out, ref_fwd(x), atol=3e-2, rtol=3e-2)

    # Second check: non-multiple batch exercising the multi-step grid + partial last block.
    B2 = 520
    x2 = jax.random.normal(kx, (B2, 1, 28, 28), dtype=jnp.float32)
    out2 = jax.block_until_ready(studentnet_forward(x2, prepped, tb=1024))
    assert out2.shape == (B2, 10)
    assert jnp.allclose(out2, ref_fwd(x2), atol=3e-2, rtol=3e-2)

    print("KERNEL_OK")
</pallas_src>

<mosaic_0001>
module attributes {stable_mosaic.version = 11 : i64} {
  func.func @studentnet_kernel(%arg0: i32, %arg1: memref<2x784xf32, #tpu.memory_space<vmem>>, %arg2: memref<784x128xbf16, #tpu.memory_space<vmem>>, %arg3: memref<1x128xf32, #tpu.memory_space<vmem>>, %arg4: memref<128x64xbf16, #tpu.memory_space<vmem>>, %arg5: memref<1x64xf32, #tpu.memory_space<vmem>>, %arg6: memref<64x128xbf16, #tpu.memory_space<vmem>>, %arg7: memref<1x128xf32, #tpu.memory_space<vmem>>, %arg8: memref<2x128xbf16, #tpu.memory_space<vmem>>) attributes {dimension_semantics = [#tpu.dimension_semantics<parallel>], iteration_bounds = array<i64: 1>, scalar_prefetch = 0 : i64, scratch_operands = 0 : i64, tpu.core_type = #tpu.core_type<tc>, window_params = [{transform_indices = @transform_0, window_bounds = array<i64: 2, 784>}, {pipeline_mode = #tpu.pipeline_mode<synchronous>, transform_indices = @transform_1, window_bounds = array<i64: 784, 128>}, {pipeline_mode = #tpu.pipeline_mode<synchronous>, transform_indices = @transform_2, window_bounds = array<i64: 1, 128>}, {pipeline_mode = #tpu.pipeline_mode<synchronous>, transform_indices = @transform_3, window_bounds = array<i64: 128, 64>}, {pipeline_mode = #tpu.pipeline_mode<synchronous>, transform_indices = @transform_4, window_bounds = array<i64: 1, 64>}, {pipeline_mode = #tpu.pipeline_mode<synchronous>, transform_indices = @transform_5, window_bounds = array<i64: 64, 128>}, {pipeline_mode = #tpu.pipeline_mode<synchronous>, transform_indices = @transform_6, window_bounds = array<i64: 1, 128>}, {transform_indices = @transform_7, window_bounds = array<i64: 2, 128>}]} {
    %c0 = arith.constant 0 : index
    %c0_0 = arith.constant 0 : index
    %0 = vector.load %arg1[%c0, %c0_0] : memref<2x784xf32, #tpu.memory_space<vmem>>, vector<2x784xf32>
    %1 = arith.truncf %0 : vector<2x784xf32> to vector<2x784xbf16>
    %c0_1 = arith.constant 0 : index
    %c0_2 = arith.constant 0 : index
    %2 = vector.load %arg2[%c0_1, %c0_2] : memref<784x128xbf16, #tpu.memory_space<vmem>>, vector<784x128xbf16>
    %cst = arith.constant dense<0.000000e+00> : vector<2x128xf32>
    %3 = tpu.matmul %1, %2, %cst {dimension_numbers = #tpu.dot_dimension_numbers<[1], [0], [0], [1], [0, 0, 1, 1], [], []>} : vector<2x784xbf16>, vector<784x128xbf16>, vector<2x128xf32> -> vector<2x128xf32>
    %c0_3 = arith.constant 0 : index
    %c0_4 = arith.constant 0 : index
    %4 = vector.load %arg3[%c0_3, %c0_4] : memref<1x128xf32, #tpu.memory_space<vmem>>, vector<1x128xf32>
    %5 = vector.broadcast %4 : vector<1x128xf32> to vector<2x128xf32>
    %6 = arith.addf %3, %5 : vector<2x128xf32>
    %cst_5 = arith.constant 0.000000e+00 : f32
    %7 = vector.broadcast %cst_5 : f32 to vector<2x128xf32>
    %8 = arith.maximumf %6, %7 : vector<2x128xf32>
    %9 = arith.truncf %8 : vector<2x128xf32> to vector<2x128xbf16>
    %c0_6 = arith.constant 0 : index
    %c0_7 = arith.constant 0 : index
    %10 = vector.load %arg4[%c0_6, %c0_7] : memref<128x64xbf16, #tpu.memory_space<vmem>>, vector<128x64xbf16>
    %cst_8 = arith.constant dense<0.000000e+00> : vector<2x64xf32>
    %11 = tpu.matmul %9, %10, %cst_8 {dimension_numbers = #tpu.dot_dimension_numbers<[1], [0], [0], [1], [0, 0, 1, 1], [], []>} : vector<2x128xbf16>, vector<128x64xbf16>, vector<2x64xf32> -> vector<2x64xf32>
    %c0_9 = arith.constant 0 : index
    %c0_10 = arith.constant 0 : index
    %12 = vector.load %arg5[%c0_9, %c0_10] : memref<1x64xf32, #tpu.memory_space<vmem>>, vector<1x64xf32>
    %13 = vector.broadcast %12 : vector<1x64xf32> to vector<2x64xf32>
    %14 = arith.addf %11, %13 : vector<2x64xf32>
    %cst_11 = arith.constant 0.000000e+00 : f32
    %15 = vector.broadcast %cst_11 : f32 to vector<2x64xf32>
    %16 = arith.maximumf %14, %15 : vector<2x64xf32>
    %17 = arith.truncf %16 : vector<2x64xf32> to vector<2x64xbf16>
    %c0_12 = arith.constant 0 : index
    %c0_13 = arith.constant 0 : index
    %18 = vector.load %arg6[%c0_12, %c0_13] : memref<64x128xbf16, #tpu.memory_space<vmem>>, vector<64x128xbf16>
    %cst_14 = arith.constant dense<0.000000e+00> : vector<2x128xf32>
    %19 = tpu.matmul %17, %18, %cst_14 {dimension_numbers = #tpu.dot_dimension_numbers<[1], [0], [0], [1], [0, 0, 1, 1], [], []>} : vector<2x64xbf16>, vector<64x128xbf16>, vector<2x128xf32> -> vector<2x128xf32>
    %c0_15 = arith.constant 0 : index
    %c0_16 = arith.constant 0 : index
    %20 = vector.load %arg7[%c0_15, %c0_16] : memref<1x128xf32, #tpu.memory_space<vmem>>, vector<1x128xf32>
    %21 = vector.broadcast %20 : vector<1x128xf32> to vector<2x128xf32>
    %22 = arith.addf %19, %21 : vector<2x128xf32>
    %cst_17 = arith.constant 0.000000e+00 : f32
    %23 = vector.broadcast %cst_17 : f32 to vector<2x128xf32>
    %24 = arith.maximumf %22, %23 : vector<2x128xf32>
    %25 = arith.truncf %24 : vector<2x128xf32> to vector<2x128xbf16>
    %c0_18 = arith.constant 0 : index
    %c0_19 = arith.constant 0 : index
    %26 = vector.load %arg8[%c0_18, %c0_19] : memref<2x128xbf16, #tpu.memory_space<vmem>>, vector<2x128xbf16>
    tpu.vector_store %arg8[%c0_18, %c0_19], %25 {strides = array<i32>} : memref<2x128xbf16, #tpu.memory_space<vmem>>, vector<2x128xbf16>,
    return
  }
  func.func @transform_0(%arg0: i32) -> (i32, i32) {
    %c0_i32 = arith.constant 0 : i32
    %c0_i32_0 = arith.constant 0 : i32
    return %arg0, %c0_i32 : i32, i32
  }
  func.func @transform_1(%arg0: i32) -> (i32, i32) {
    %c0_i32 = arith.constant 0 : i32
    %c0_i32_0 = arith.constant 0 : i32
    %c0_i32_1 = arith.constant 0 : i32
    return %c0_i32, %c0_i32_0 : i32, i32
  }
  func.func @transform_2(%arg0: i32) -> (i32, i32) {
    %c0_i32 = arith.constant 0 : i32
    %c0_i32_0 = arith.constant 0 : i32
    %c0_i32_1 = arith.constant 0 : i32
    return %c0_i32, %c0_i32_0 : i32, i32
  }
  func.func @transform_3(%arg0: i32) -> (i32, i32) {
    %c0_i32 = arith.constant 0 : i32
    %c0_i32_0 = arith.constant 0 : i32
    %c0_i32_1 = arith.constant 0 : i32
    return %c0_i32, %c0_i32_0 : i32, i32
  }
  func.func @transform_4(%arg0: i32) -> (i32, i32) {
    %c0_i32 = arith.constant 0 : i32
    %c0_i32_0 = arith.constant 0 : i32
    %c0_i32_1 = arith.constant 0 : i32
    return %c0_i32, %c0_i32_0 : i32, i32
  }
  func.func @transform_5(%arg0: i32) -> (i32, i32) {
    %c0_i32 = arith.constant 0 : i32
    %c0_i32_0 = arith.constant 0 : i32
    %c0_i32_1 = arith.constant 0 : i32
    return %c0_i32, %c0_i32_0 : i32, i32
  }
  func.func @transform_6(%arg0: i32) -> (i32, i32) {
    %c0_i32 = arith.constant 0 : i32
    %c0_i32_0 = arith.constant 0 : i32
    %c0_i32_1 = arith.constant 0 : i32
    return %c0_i32, %c0_i32_0 : i32, i32
  }
  func.func @transform_7(%arg0: i32) -> (i32, i32) {
    %c0_i32 = arith.constant 0 : i32
    %c0_i32_0 = arith.constant 0 : i32
    return %arg0, %c0_i32 : i32, i32
  }
}

</mosaic_0001>

<bundles_post_ra>
// kernel: tpu_custom_call.1
= control target key start
LH: loop header
LB: loop body
LE: loop exit
PB: predicated region body
PF: predicated region fallthrough
CT: control target
= control target key end

     0   :  { %12 = vsyncpa [#allocation3], 0  ;;  %s1318_s0 = inlined_call_operand.vmem [shape: f32[2,784], index: 0, kind: input, shape index: {}]   ;;  %s1319_s1 = inlined_call_operand.hbm [shape: bf16[784,128], index: 1, kind: input, shape index: {}]   ;;  %s1320_s2 = inlined_call_operand.vmem [shape: f32[1,128], index: 2, kind: input, shape index: {}]   ;;  %s1321_s3 = inlined_call_operand.vmem [shape: bf16[128,64], index: 3, kind: input, shape index: {}]   ;;  %s1322_s4 = inlined_call_operand.vmem [shape: f32[1,64], index: 4, kind: input, shape index: {}]   ;;  %s1323_s5 = inlined_call_operand.vmem [shape: bf16[64,128], index: 5, kind: input, shape index: {}]   ;;  %s1324_s6 = inlined_call_operand.vmem [shape: f32[1,128], index: 6, kind: input, shape index: {}]   ;;  %s1325_s7 = inlined_call_operand.hbm [shape: bf16[2,128], index: 7, kind: output, shape index: {}]  }
   0x1   :  { %13 = vsyncpa [#allocation4], 0  ;;  %s1176_s24 = smov [#allocation2]   ;;  %s1128_s28 = scalar_lea.hbm %s1319_s1, 6272 }
   0x2   :  { %s21_s25 = sshll.u32 %s1176_s24, 4  ;;  %p1129_p0 = scmp.ne.s32.totalorder %s1319_s1, %s1128_s28  ;;  %s22_s25 = int_to_ptr.vmem [resolvable:$true] %s21_s25 }
   0x3   :  { %p1132_p1 = scmp.lt.u32.totalorder %s1128_s28, %s1319_s1 }
   0x5   :  { %p1134_p2 = pnand %p1132_p1, %p1129_p0 }
   0x7   :  { %1137 = shalt.err (!%p1134_p2)
}
   0x8   :  { %s1138_s10 = scalar_lea.vmem %s22_s25, 6272  ;;  %p1143_p4 = scmp.lt.s32.totalorder %s22_s25, %s22_s25 }
   0x9   :  { %p1139_p3 = scmp.ne.s32.totalorder %s22_s25, %s1138_s10  ;;  %p1144_p5 = scmp.lt.s32.totalorder %s1138_s10, %s1138_s10 }
   0xb   :  { %p1145_p6 = por %p1144_p5, %p1143_p4 }
   0xd   :  { %p1146_p7 = pnand %p1145_p6, %p1139_p3 }
   0xf   :  { %1149 = shalt.err (!%p1146_p7)
}
  0x10   :  { %s1177_s11 = smov 64   ;;  %s1178_s12 = smov 4  }
  0x11   :  { %27 = dma.hbm_to_vmem [thread:$0]  %s1319_s1, 6272, %s22_s25, [#allocation3], %s1177_s11, %s1177_s11, %s1178_s12  }
  0x12   :  { %1172 = dma.done.wait [#allocation3], 6272  }
  0x13   :  { %1173 = vsyncadd [#allocation3], 4294961024  ;;  %v1065_v0 = vld [vmem:[#allocation2 + $0x40] sm:$0xff]   ;;  %v1069_v4 = vld [vmem:[#allocation2 + $0x48] sm:$0xff]   ;;  %v1179_v21 = vmov 1983009808   ;;  %v50_v23 = vlaneseq }
  0x14   :  { %v1066_v1 = vld [vmem:[#allocation2] sm:$0xff]   ;;  %938 = vmatprep.subr.bf16.mxu0 %v1065_v0  ;;  %v1070_v5 = vld [vmem:[#allocation2 + $0x8] sm:$0xff]   ;;  %v1073_v8 = vld [vmem:[#allocation2 + $0x50] sm:$0xff]   ;;  %v48_v22 = vunpack.c.l.s4 %v1179_v21  ;;  %v1180_v45 = vmov 0.0   ;;  %vm1181_vm0 = vmmov 0   ;;  %vm492_vm1 = vcmask 130048  }
  0x15   :  { %v1067_v2 = vld [vmem:[#allocation2 + $0xc0] sm:$0xff]   ;;  %939 = vmatpush3.bf16.msra.mxu0 %v1066_v1  ;;  %v1071_v6 = vld [vmem:[#allocation2 + $0xc8] sm:$0xff]   ;;  %v1074_v9 = vld [vmem:[#allocation2 + $0x10] sm:$0xff]   ;;  %v51_v29 = vshrl.u32 %v50_v23, 7  ;;  %vm810_vm2 = vcmask 523264  }
  0x16   :  { %v1068_v3 = vld [vmem:[#allocation2 + $0x80] sm:$0xff]   ;;  %960 = vmatprep.subr.bf16.mxu1 %v1067_v2  ;;  %940 = vmatprep.subr.bf16.mxu0 %v1069_v4  ;;  %v1072_v7 = vld [vmem:[#allocation2 + $0x88] sm:$0xff]   ;;  %v1075_v10 = vld [vmem:[#allocation2 + $0xd0] sm:$0xff]   ;;  %v49_v28 = vunpack.c.0.s8 %v48_v22 }
  0x17   :  { %961 = vmatpush3.bf16.msra.mxu1 %v1068_v3  ;;  %v1076_v11 = vld [vmem:[#allocation2 + $0x90] sm:$0xff]   ;;  %v1077_v12 = vld [vmem:[#allocation2 + $0x58] sm:$0xff]   ;;  %v1081_v16 = vld [vmem:[#allocation2 + $0x60] sm:$0xff]  }
  0x18   :  { %962 = vmatprep.subr.bf16.mxu1 %v1071_v6  ;;  %v1078_v13 = vld [vmem:[#allocation2 + $0x18] sm:$0xff]   ;;  %v1082_v17 = vld [vmem:[#allocation2 + $0x20] sm:$0xff]   ;;  %v1085_v20 = vld [vmem:[#allocation2 + $0x68] sm:$0xff]   ;;  %v52_v34 = vsub.s32 %v49_v28, %v51_v29 }
  0x19   :  { %941 = vmatpush3.bf16.msra.mxu0 %v1070_v5  ;;  %v1079_v14 = vld [vmem:[#allocation2 + $0xd8] sm:$0xff]   ;;  %v1083_v18 = vld [vmem:[#allocation2 + $0xe0] sm:$0xff]   ;;  %v1086_v24 = vld [vmem:[#allocation2 + $0x28] sm:$0xff]  }
  0x1a   :  { %942 = vmatprep.subr.bf16.mxu0 %v1073_v8  ;;  %v1080_v15 = vld [vmem:[#allocation2 + $0x98] sm:$0xff]   ;;  %v1084_v19 = vld [vmem:[#allocation2 + $0xa0] sm:$0xff]   ;;  %v1087_v25 = vld [vmem:[#allocation2 + $0xe8] sm:$0xff]  }
  0x1b   :  { %963 = vmatpush3.bf16.msra.mxu1 %v1072_v7  ;;  %v1088_v26 = vld [vmem:[#allocation2 + $0xa8] sm:$0xff]   ;;  %v1089_v27 = vld [vmem:[#allocation2 + $0x70] sm:$0xff]   ;;  %v1093_v33 = vld [vmem:[#allocation2 + $0x78] sm:$0xff]  }
  0x1c   :  { %964 = vmatprep.subr.bf16.mxu1 %v1075_v10  ;;  %v1090_v30 = vld [vmem:[#allocation2 + $0x30] sm:$0xff]   ;;  %v1094_v35 = vld [vmem:[#allocation2 + $0x38] sm:$0xff]   ;;  %v42_v37 = vld [vmem:[%s1318_s0] sm:$0xff] }
  0x1d   :  { %943 = vmatpush3.bf16.msra.mxu0 %v1074_v9  ;;  %v1091_v31 = vld [vmem:[#allocation2 + $0xf0] sm:$0xff]   ;;  %v1095_v36 = vld [vmem:[#allocation2 + $0xf8] sm:$0xff]   ;;  %v53_v38 = vrot.slane %v42_v37, %v52_v34  ;;  %v46_v40 = vcombine.high %v42_v37, %v42_v37  ;;  %v1097_v41 = vld [vmem:[#allocation2 + $0x140] sm:$0xff]  }
  0x1e   :  { %944 = vmatprep.subr.bf16.mxu0 %v1077_v12  ;;  %v1092_v32 = vld [vmem:[#allocation2 + $0xb0] sm:$0xff]   ;;  %v1096_v39 = vld [vmem:[#allocation2 + $0xb8] sm:$0xff]   ;;  %v1099_v48 = vld [vmem:[#allocation2 + $0x100] sm:$0xff]  }
  0x1f   :  { %965 = vmatpush3.bf16.msra.mxu1 %v1076_v11  ;;  %v61_v42 = vcombine.high %v53_v38, %v53_v38  ;;  %v60_v43 = vrot.slane %v46_v40, %v52_v34  ;;  %v86_v44 = vpack.c.bf16 %v53_v38, %v53_v38  ;;  %v1100_v50 = vld [vmem:[#allocation2 + $0x148] sm:$0xff]   ;;  %v1102_v53 = vld [vmem:[#allocation2 + $0x150] sm:$0xff]   ;;  %v1104_v55 = vld [vmem:[#allocation2 + $0x158] sm:$0xff]  }
  0x20   :  { %966 = vmatprep.subr.bf16.mxu1 %v1079_v14  ;;  %v1101_v52 = vld [vmem:[#allocation2 + $0x108] sm:$0xff]   ;;  %v1103_v54 = vld [vmem:[#allocation2 + $0x110] sm:$0xff]   ;;  %v1105_v56 = vld [vmem:[#allocation2 + $0x118] sm:$0xff]  }
  0x21   :  { %945 = vmatpush3.bf16.msra.mxu0 %v1078_v13  ;;  %v87_v46 = vpack.c.bf16 %v61_v42, %v61_v42  ;;  %v62_v47 = vcombine.high %v60_v43, %v60_v43  ;;  %v88_v49 = vpack.c.bf16 %v60_v43, %v60_v43  ;;  %v1106_v57 = vld [vmem:[#allocation2 + $0x160] sm:$0xff]   ;;  %v43_v59 = vld [vmem:[%s1318_s0 + $0x8] sm:$0x3f]  ;;  %v1110_v5 = vld [vmem:[#allocation2 + $0x170] sm:$0xff]  }
  0x22   :  { %946 = vmatprep.subr.bf16.mxu0 %v1081_v16  ;;  %v1114_v58 = vld [vmem:[#allocation2 + $0x180] sm:$0xff]   ;;  %v63_v61 = vcombine.high %v43_v59, %v43_v59  ;;  %v70_v62 = vrot.slane %v43_v59, %v52_v34  ;;  %v1108_v63 = vld [vmem:[#allocation2 + $0x168] sm:$0xff]   ;;  %v1111_v6 = vld [vmem:[#allocation2 + $0x130] sm:$0xff]  }
  0x23   :  { %967 = vmatpush3.bf16.msra.mxu1 %v1080_v15  ;;  %528 = vmatprep.mubr.bf16.mxu0 %v87_v46  ;;  %v89_v51 = vpack.c.bf16 %v62_v47, %v62_v47  ;;  %v1107_v60 = vld [vmem:[#allocation2 + $0x120] sm:$0xff]   ;;  %v1109_v2 = vld [vmem:[#allocation2 + $0x128] sm:$0xff]   ;;  %v1112_v7 = vld [vmem:[#allocation2 + $0x178] sm:$0xff]  }
  0x24   :  { %968 = vmatprep.subr.bf16.mxu1 %v1083_v18  ;;  %v77_v0 = vrot.slane %v63_v61, %v52_v34  ;;  %v78_v1 = vcombine.high %v70_v62, %v70_v62  ;;  %v1113_v8 = vld [vmem:[#allocation2 + $0x138] sm:$0xff]   ;;  %v90_v9 = vpack.c.bf16 %v70_v62, %v70_v62  ;;  %v1116_v10 = vld [vmem:[%s1321_s3] sm:$0xff]   ;;  %v1117_v11 = vld [vmem:[%s1321_s3 + $0x8] sm:$0xff]  }
  0x25   :  { %947 = vmatpush3.bf16.msra.mxu0 %v1082_v17  ;;  %568 = vmatprep.mubr.bf16.mxu1 %v89_v51  ;;  %v1118_v12 = vld [vmem:[%s1321_s3 + $0x10] sm:$0xff]   ;;  %v1119_v13 = vld [vmem:[%s1321_s3 + $0x18] sm:$0xff]   ;;  %v1120_v14 = vld [vmem:[%s1321_s3 + $0x20] sm:$0xff]  }
  0x26   :  { %948 = vmatprep.subr.bf16.mxu0 %v1085_v20  ;;  %v91_v3 = vpack.c.bf16 %v78_v1, %v78_v1  ;;  %v92_v4 = vpack.c.bf16 %v77_v0, %v77_v0  ;;  %v1121_v15 = vld [vmem:[%s1321_s3 + $0x28] sm:$0xff]   ;;  %v1122_v16 = vld [vmem:[%s1321_s3 + $0x30] sm:$0xff]   ;;  %v1123_v17 = vld [vmem:[%s1321_s3 + $0x38] sm:$0xff]  }
  0x27   :  { %969 = vmatpush3.bf16.msra.mxu1 %v1084_v19  ;;  %v1124_v18 = vld [vmem:[%s1323_s5] sm:$0xff]   ;;  %v1125_v19 = vld [vmem:[%s1323_s5 + $0x8] sm:$0xff]   ;;  %v1126_v47 = vld [vmem:[%s1323_s5 + $0x10] sm:$0xff]  }
  0x28   :  { %970 = vmatprep.subr.bf16.mxu1 %v1087_v25  ;;  %v872_v21 = vld [vmem:[%s1320_s2] ss:$0 sm:$0xff] }
  0x29   :  { %949 = vmatpush3.bf16.msra.mxu0 %v1086_v24 }
  0x2a   :  { %950 = vmatprep.subr.bf16.mxu0 %v1089_v27 }
  0x2b   :  { %971 = vmatpush3.bf16.msra.mxu1 %v1088_v26 }
  0x2c   :  { %972 = vmatprep.subr.bf16.mxu1 %v1091_v31 }
  0x2d   :  { %951 = vmatpush3.bf16.msra.mxu0 %v1090_v30 }
  0x2e   :  { %952 = vmatprep.subr.bf16.mxu0 %v1093_v33 }
  0x2f   :  { %973 = vmatpush3.bf16.msra.mxu1 %v1092_v32 }
  0x30   :  { %974 = vmatprep.subr.bf16.mxu1 %v1095_v36 }
  0x31   :  { %953 = vmatpush3.bf16.msra.mxu0 %v1094_v35 }
  0x32   :  { %982 = vmatprep.subr.bf16.mxu0 %v1097_v41 }
  0x33   :  { %975 = vmatpush3.bf16.msra.mxu1 %v1096_v39 }
  0x34   :  { %1020 = vmatprep.subr.bf16.mxu1 %v1180_v45  ;;  %529 = vmatmul.mubr.bf16.vlgmr.msra.gmra.mrb[0].mxu0 %v86_v44 }
  0x35   :  { %983 = vmatpush3.bf16.msra.mxu0 %v1099_v48  ;;  %608 = vmatprep.mubr.bf16.mxu0 %v91_v3  ;;  %v1127_v48 = vld [vmem:[%s1323_s5 + $0x18] sm:$0xff]   ;;  %s1182_s5 = smov [#allocation5]  }
  0x36   :  { %569 = vmatmul.mubr.bf16.vlgmr.msra.gmra.mrb[0].mxu1 %v88_v49  ;;  %984 = vmatprep.subr.bf16.mxu0 %v1100_v50  ;;  %v923_v49 = vld [vmem:[%s1322_s4] ss:$0 sm:$0xff]  ;;  %s863_s20 = sshll.u32 %s1182_s5, 4  ;;  %s864_s20 = int_to_ptr.vmem [resolvable:$true] %s863_s20 }
  0x37   :  { %1022 = vmatprep.mubr.msk.bf16.mxu1 %vm1181_vm0, %v1180_v45  ;;  %1021 = vmatpush3.bf16.msra.mxu1 %v1114_v58  ;;  %s1150_s4 = scalar_lea.vmem %s864_s20, 16  ;;  %s1154_s21 = scalar_lea.vmem %s864_s20, 32 }
  0x38   :  { %1026 = vmatprep.subr.bf16.mxu1 %v1180_v45  ;;  %p1151_p8 = scmp.ne.s32.totalorder %s864_s20, %s1150_s4  ;;  %p1155_p9 = scmp.lt.s32.totalorder %s864_s20, %s864_s20 }
  0x39   :  { %985 = vmatpush3.bf16.msra.mxu0 %v1101_v52  ;;  %p1156_p10 = scmp.lt.s32.totalorder %s1154_s21, %s1150_s4 }
  0x3a   :  { %986 = vmatprep.subr.bf16.mxu0 %v1102_v53 }
  0x3b   :  { %p1157_p11 = por %p1156_p10, %p1155_p9 }
  0x3d   :  { %987 = vmatpush3.bf16.msra.mxu0 %v1103_v54  ;;  %p1158_p12 = pnand %p1157_p11, %p1151_p8 }
  0x3e   :  { %988 = vmatprep.subr.bf16.mxu0 %v1104_v55  ;;  %1023 = vmatmul.mubr.msk.bf16.vlgmr.msra.gmra.mrb[4].mxu1 %vm492_vm1, %v92_v4 }
  0x3f   :  { %1042 = vmatprep.mubr.msk.bf16.mxu1 %vm1181_vm0, %v1180_v45  ;;  %1027 = vmatpush3.bf16.msra.mxu1 %v1116_v10 }
  0x40   :  { %1028 = vmatprep.subr.bf16.mxu1 %v1180_v45 }
  0x41   :  { %989 = vmatpush3.bf16.msra.mxu0 %v1105_v56 }
  0x42   :  { %990 = vmatprep.subr.bf16.mxu0 %v1106_v57 }
  0x43   :  { %1029 = vmatpush3.bf16.msra.mxu1 %v1117_v11 }
  0x44   :  { %1030 = vmatprep.subr.bf16.mxu1 %v1180_v45 }
  0x45   :  { %991 = vmatpush3.bf16.msra.mxu0 %v1107_v60 }
  0x46   :  { %992 = vmatprep.subr.bf16.mxu0 %v1108_v63 }
  0x47   :  { %1031 = vmatpush3.bf16.msra.mxu1 %v1118_v12 }
  0x48   :  { %1032 = vmatprep.subr.bf16.mxu1 %v1180_v45 }
  0x49   :  { %993 = vmatpush3.bf16.msra.mxu0 %v1109_v2 }
  0x4a   :  { %994 = vmatprep.subr.bf16.mxu0 %v1110_v5 }
  0x4b   :  { %1033 = vmatpush3.bf16.msra.mxu1 %v1119_v13 }
  0x4c   :  { %1034 = vmatprep.subr.bf16.mxu1 %v1180_v45 }
  0x4d   :  { %995 = vmatpush3.bf16.msra.mxu0 %v1111_v6 }
  0x4e   :  { %996 = vmatprep.subr.bf16.mxu0 %v1112_v7 }
  0x4f   :  { %1035 = vmatpush3.bf16.msra.mxu1 %v1120_v14 }
  0x50   :  { %1036 = vmatprep.subr.bf16.mxu1 %v1180_v45 }
  0x51   :  { %997 = vmatpush3.bf16.msra.mxu0 %v1113_v8 }
  0x52   :  { %1046 = vmatprep.subr.bf16.mxu0 %v1180_v45 }
  0x53   :  { %1037 = vmatpush3.bf16.msra.mxu1 %v1121_v15 }
  0x54   :  { %609 = vmatmul.mubr.bf16.vlgmr.msra.gmra.mrb[4].mxu0 %v90_v9  ;;  %1038 = vmatprep.subr.bf16.mxu1 %v1180_v45 }
  0x55   :  { %1054 = vmatprep.mubr.msk.bf16.mxu0 %vm1181_vm0, %v1180_v45  ;;  %1047 = vmatpush3.bf16.msra.mxu0 %v1124_v18 }
  0x56   :  { %1048 = vmatprep.subr.bf16.mxu0 %v1180_v45 }
  0x57   :  { %1039 = vmatpush3.bf16.msra.mxu1 %v1122_v16 }
  0x58   :  { %1040 = vmatprep.subr.bf16.mxu1 %v1180_v45 }
  0x59   :  { %1049 = vmatpush3.bf16.msra.mxu0 %v1125_v19 }
  0x5a   :  { %1050 = vmatprep.subr.bf16.mxu0 %v1180_v45 }
  0x5b   :  { %1041 = vmatpush3.bf16.msra.mxu1 %v1123_v17 }
  0x5d   :  { %1051 = vmatpush3.bf16.msra.mxu0 %v1126_v47 }
  0x5e   :  { %1052 = vmatprep.subr.bf16.mxu0 %v1180_v45  ;;  %v932_v45 = vld [vmem:[%s1324_s6] ss:$0 sm:$0xff] }
  0x61   :  { %1053 = vmatpush3.bf16.msra.mxu0 %v1127_v48 }
 0x107   :  { %v954_v20 = vpop.f32.mrb[0].mxu0 }
 0x108   :  { %v955_v22 = vpop.f32.mrb[1].mxu0 }
 0x109   :  { %v956_v23 = vadd.f32 %v955_v22, %v954_v20  ;;  %v957_v24 = vpop.f32.mrb[2].mxu0  ;;  %v976_v25 = vpop.f32.mrb[0].mxu1 }
 0x10a   :  { %v958_v26 = vpop.f32.mrb[3].mxu0  ;;  %v977_v27 = vpop.f32.mrb[1].mxu1 }
 0x10b   :  { %v531_v28 = vadd.f32 %v956_v23, %v872_v21  ;;  %v978_v29 = vadd.f32 %v977_v27, %v976_v25  ;;  %v979_v30 = vpop.f32.mrb[2].mxu1 }
 0x10c   :  { %v980_v31 = vpop.f32.mrb[3].mxu1 }
 0x10d   :  { %v571_v32 = vadd.f32 %v978_v29, %v531_v28 }
 0x111   :  { %v650_v33 = vpop.f32.mrb[4].mxu1 }
 0x112   :  { %v1024_v34 = vpop.f32.mrb[5].mxu1 }
 0x113   :  { %v653_v35 = vpop.f32.mrb[6].mxu1 }
 0x114   :  { %v1025_v36 = vpop.f32.mrb[7].mxu1 }
 0x127   :  { %v998_v37 = vpop.f32.mrb[4].mxu0 }
 0x128   :  { %v999_v38 = vpop.f32.mrb[5].mxu0 }
 0x129   :  { %v1000_v39 = vadd.f32 %v999_v38, %v998_v37  ;;  %v1001_v40 = vpop.f32.mrb[6].mxu0 }
 0x12a   :  { %v1002_v41 = vpop.f32.mrb[7].mxu0 }
 0x12b   :  { %v611_v42 = vadd.f32 %v1000_v39, %v571_v32 }
 0x12d   :  { %v651_v43 = vadd.f32 %v650_v33, %v611_v42 }
 0x12f   :  { %v656_v44 = vmax.f32 %v651_v43, 0.0 }
 0x131   :  { %v657_v46 = vpack.c.bf16 %v656_v44, %v656_v44 }
 0x133   :  { %1043 = vmatmul.mubr.bf16.vlgmr.msra.gmra.mrb[8].mxu1 %v657_v46 }
 0x206   :  { %v763_v50 = vpop.f32.mrb[8].mxu1 }
 0x207   :  { %v764_v51 = vadd.f32 %v923_v49, %v763_v50  ;;  %v1044_v52 = vpop.f32.mrb[9].mxu1 }
 0x208   :  { %v766_v53 = vpop.f32.mrb[10].mxu1 }
 0x209   :  { %v769_v54 = vmax.f32 %v764_v51, 0.0  ;;  %v1045_v55 = vpop.f32.mrb[11].mxu1 }
 0x20b   :  { %v770_v56 = vpack.c.bf16 %v769_v54, %v769_v54 }
 0x20d   :  { %1055 = vmatmul.mubr.msk.bf16.vlgmr.msra.gmra.mrb[8].mxu0 %vm810_vm2, %v770_v56 }
 0x2e0   :  { %v848_v57 = vpop.f32.mrb[8].mxu0 }
 0x2e1   :  { %v849_v58 = vadd.f32 %v932_v45, %v848_v57  ;;  %v1056_v59 = vpop.f32.mrb[9].mxu0 }
 0x2e2   :  { %v851_v60 = vpop.f32.mrb[10].mxu0 }
 0x2e3   :  { %v854_v61 = vmax.f32 %v849_v58, 0.0  ;;  %v1057_v62 = vpop.f32.mrb[11].mxu0 }
 0x2e5   :  { %v855_v63 = vpack.c.bf16 %v854_v61, %v854_v61 }
 0x2e7   :  { %856 = vst [vmem:[#allocation5] sm:$0x1] %v855_v63 }
 0x2e8   :  { %1161 = shalt.err (!%p1158_p12)
}
 0x2e9   :  { %s1162_s23 = scalar_lea.hbm %s1325_s7, 16 }
 0x2ea   :  { %p1163_p13 = scmp.ne.s32.totalorder %s1325_s7, %s1162_s23  ;;  %p1166_p0 = scmp.lt.u32.totalorder %s1162_s23, %s1325_s7 }
 0x2ec   :  { %p1168_p1 = pnand %p1166_p0, %p1163_p13 }
 0x2ee   :  { %1171 = shalt.err (!%p1168_p1)
}
 0x2ef   :  { %866 = dma.vmem_to_hbm [thread:$0]  %s864_s20, 16, %s1325_s7, [#allocation4]  }
 0x2f0   :  { %1174 = dma.done.wait [#allocation4], 16  }
 0x2f1   :  { %1175 = vsyncadd [#allocation4], 4294967280 }
 0x2f2   :  { %870 = vsyncpa [#allocation3], 1 }
 0x2f3   :  { %871 = vsyncpa [#allocation4], 1 }

</bundles_post_ra>
